<compile_context>
chip_gen: v7x
topology: tpu7x:2x2x1
jax: 0.10.0
libtpu: 0.0.40
codegen_flags: <defaults>
</compile_context>

<pallas_src>
import functools

import jax
import jax.numpy as jnp
from jax import lax
from jax.experimental import pallas as pl
from jax.experimental.pallas import tpu as pltpu


def se_kernel(x_ref, w1_ref, w2_ref, o_ref, *, inv_hw, n_full, tail, group):
    bt, c, hw = x_ref.shape
    lanes_per_group = group * 128
    n_groups = n_full // group          # group always divides n_full

    def _off(base, j):
        off = base + j * 128
        if isinstance(off, int):
            return off
        return pl.multiple_of(off, 128)

    # ---- pass 1: global average pool --------------------------------------
    # (bt, C, 128) f32 lane-partial accumulator: one VPU add per 128-lane
    # slice; the single cross-lane (XLU) reduce happens once after the loop.
    def add_slices(acc, base, count):
        for j in range(count):
            acc = acc + x_ref[:, :, pl.ds(_off(base, j), 128)].astype(jnp.float32)
        return acc

    acc = jnp.zeros((bt, c, 128), jnp.float32)
    if n_groups == 1:
        acc = add_slices(acc, 0, group)                 # fully static / unrolled
    elif n_groups > 1:
        acc = lax.fori_loop(
            0, n_groups,
            lambda g, a: add_slices(a, g * lanes_per_group, group),
            acc)

    pooled = jnp.sum(acc, axis=-1)                      # (bt, C) single XLU reduce
    if tail:                                            # ragged tail (< 128 lanes)
        pooled = pooled + jnp.sum(
            x_ref[:, :, pl.ds(n_full * 128, tail)].astype(jnp.float32), axis=-1)
    pooled = pooled * inv_hw

    # ---- squeeze-excitation MLP (weights pre-cast once in the wrapper) ----
    w1 = w1_ref[...]                                    # (C, C) = (out, in)
    w2 = w2_ref[...]
    h = lax.dot_general(pooled.astype(w1.dtype), w1, (((1,), (1,)), ((), ())),
                        preferred_element_type=jnp.float32)     # pooled @ W1^T
    h = jnp.maximum(h, 0.0)
    s = lax.dot_general(h.astype(w2.dtype), w2, (((1,), (1,)), ((), ())),
                        preferred_element_type=jnp.float32)     # h @ W2^T
    s = jax.nn.sigmoid(s)

    # ---- pass 2: channel-wise rescale in x's native dtype -----------------
    scale = s.astype(o_ref.dtype)[:, :, None]           # (bt, C, 1)

    def scale_slices(base, count):
        for j in range(count):
            sl = pl.ds(_off(base, j), 128)
            o_ref[:, :, sl] = x_ref[:, :, sl] * scale

    if n_groups == 1:
        scale_slices(0, group)
    elif n_groups > 1:
        @pl.loop(0, n_groups)
        def _(g):
            scale_slices(g * lanes_per_group, group)

    if tail:
        sl = pl.ds(n_full * 128, tail)
        o_ref[:, :, sl] = x_ref[:, :, sl] * scale        # masked partial store


def _tpu_info():
    """Best-effort (physical VMEM bytes per TensorCore, TensorCores per chip)."""
    vmem_cap = None
    try:
        vmem_cap = int(getattr(pltpu.get_tpu_info(), "vmem_capacity_bytes"))
    except Exception:
        vmem_cap = None
    kind = ""
    try:
        kind = str(jax.devices()[0].device_kind).lower()
    except Exception:
        kind = ""
    if vmem_cap is None or vmem_cap <= 0:
        # v5e/v6e: 128 MiB per TC; v7x: 64 MiB. Be conservative unless we can
        # positively identify an older generation.
        vmem_cap = (128 if ("v5" in kind or "v6" in kind) else 64) * 1024 * 1024
    # v7x has 2 TensorCores sharing the grid under "parallel" semantics.
    num_tc = 2 if ("7" in kind or vmem_cap <= 80 * 1024 * 1024) else 1
    return vmem_cap, num_tc


def se_block(x, w1, w2, *, vmem_budget_bytes=None):
    """x: (B, C, H, W); w1, w2: (C, C) Linear weights (out_features, in_features)."""
    B, C, H, W = x.shape
    HW = H * W
    mib = 1024 * 1024

    x_flat = x.reshape(B, C, HW)          # contiguous reshape: no extra HBM pass

    # Pre-cast weights once (hoists per-grid-step (C, C) casts out of the kernel).
    w_dtype = jnp.bfloat16 if x.dtype == jnp.bfloat16 else jnp.float32
    w1c = w1.astype(w_dtype)
    w2c = w2.astype(w_dtype)

    vmem_cap, num_tc = _tpu_info()
    if vmem_budget_bytes is None:
        vmem_budget_bytes = int(0.75 * vmem_cap)
    # Never budget past physical VMEM minus headroom (keeps callers safe on v7x).
    budget = max(min(int(vmem_budget_bytes), vmem_cap - 8 * mib), 8 * mib)

    # Real VMEM tile footprint: C padded to the sublane packing granularity,
    # HW padded to 128 lanes.
    itemsize = jnp.dtype(x.dtype).itemsize
    sub = 8 * max(1, 4 // itemsize)                     # 8 f32 / 16 bf16 / 32 i8
    c_pad = -(-C // sub) * sub
    hw_lanes = -(-HW // 128) * 128
    tile_bytes = c_pad * hw_lanes * itemsize            # one image's x tile
    w_bytes = (w1c.size + w2c.size) * jnp.dtype(w_dtype).itemsize
    slack = 4 * mib

    def vmem_need(bt):
        io = 4 * bt * tile_bytes                        # in + out, double-buffered
        acc = bt * c_pad * 128 * 4                      # f32 pooling accumulator
        return io + acc + w_bytes + slack

    # Largest power-of-two batch tile that fits the budget.
    bt = 1
    while 2 * bt <= B and vmem_need(2 * bt) <= budget:
        bt *= 2
    if num_tc >= 2 and B >= 2:
        # 2-TC chips (v7x): even number of grid steps so both TensorCores get
        # equal work. Single-TC chips keep the largest tile (no halving).
        while bt > 1 and ((B % bt) or ((B // bt) % 2)):
            bt -= 1
    while B % bt:                                       # exact grid, no partial blocks
        bt -= 1

    vmem_limit = int(min(max(vmem_need(bt), 16 * mib),
                         max(vmem_cap - 8 * mib, 16 * mib)))

    # In-kernel spatial chunking: full 128-lane slices, `group` at a time as
    # straight-line code, plus one masked tail slice.
    n_full, tail = HW // 128, HW % 128
    if n_full == 0:
        group = 1
    elif n_full <= 16:
        group = n_full                                  # fully static / unrolled
    else:
        group = 1
        for u in (8, 4, 2):
            if n_full % u == 0:
                group = u
                break

    kernel = functools.partial(se_kernel, inv_hw=1.0 / HW,
                               n_full=n_full, tail=tail, group=group)

    out_flat = pl.pallas_call(
        kernel,
        out_shape=jax.ShapeDtypeStruct((B, C, HW), x.dtype),
        grid_spec=pltpu.PrefetchScalarGridSpec(
            num_scalar_prefetch=0,
            grid=(B // bt,),
            in_specs=[
                pl.BlockSpec((bt, C, HW), lambda b: (b, 0, 0)),
                # Constant weights: whole array resident in VMEM, single copy,
                # no per-step DMA / double-buffering.
                pl.BlockSpec(memory_space=pltpu.MemorySpace.VMEM),
                pl.BlockSpec(memory_space=pltpu.MemorySpace.VMEM),
            ],
            out_specs=pl.BlockSpec((bt, C, HW), lambda b: (b, 0, 0)),
        ),
        compiler_params=pltpu.CompilerParams(
            dimension_semantics=("parallel",),
            vmem_limit_bytes=vmem_limit),
    )(x_flat, w1c, w2c)

    return out_flat.reshape(B, C, H, W)


def se_block_ref(x, w1, w2):
    """Pure-JAX reference matching the PyTorch forward (residual=None)."""
    y = jnp.mean(x, axis=(2, 3))                   # (B, C)  AdaptiveAvgPool2d(1)
    y = jnp.maximum(y @ w1.T, 0.0)                 # Linear + ReLU
    y = jax.nn.sigmoid(y @ w2.T)                   # Linear + Sigmoid
    return x * y[:, :, None, None]                 # broadcast scale


if __name__ == "__main__":
    B, C, H, W = 2, 4, 16, 16

    key = jax.random.PRNGKey(0)
    kx, k1, k2 = jax.random.split(key, 3)

    x = jax.random.normal(kx, (B, C, H, W), dtype=jnp.float32)
    # deterministic Linear(C, C, bias=False) weights, (out_features, in_features)
    bound = 1.0 / (C ** 0.5)
    w1 = jax.random.uniform(k1, (C, C), jnp.float32, -bound, bound)
    w2 = jax.random.uniform(k2, (C, C), jnp.float32, -bound, bound)

    out = jax.block_until_ready(se_block(x, w1, w2))
    ref = se_block_ref(x, w1, w2)

    assert out.shape == (B, C, H, W)
    assert jnp.allclose(out, ref, atol=1e-5, rtol=1e-5), "mismatch vs reference"

    print("KERNEL_OK")
</pallas_src>

<mosaic_0001>
module attributes {stable_mosaic.version = 11 : i64} {
  func.func @se_kernel(%arg0: i32, %arg1: memref<1x4x256xf32, #tpu.memory_space<vmem>>, %arg2: memref<4x4xf32, #tpu.memory_space<vmem>>, %arg3: memref<4x4xf32, #tpu.memory_space<vmem>>, %arg4: memref<1x4x256xf32, #tpu.memory_space<vmem>>) attributes {dimension_semantics = [#tpu.dimension_semantics<parallel>], iteration_bounds = array<i64: 2>, scalar_prefetch = 0 : i64, scratch_operands = 0 : i64, tpu.core_type = #tpu.core_type<tc>, window_params = [{transform_indices = @transform_0, window_bounds = array<i64: 1, 4, 256>}, {pipeline_mode = #tpu.pipeline_mode<synchronous>, transform_indices = @transform_1, window_bounds = array<i64: 4, 4>}, {pipeline_mode = #tpu.pipeline_mode<synchronous>, transform_indices = @transform_2, window_bounds = array<i64: 4, 4>}, {transform_indices = @transform_3, window_bounds = array<i64: 1, 4, 256>}]} {
    %cst = arith.constant 0.000000e+00 : f32
    %0 = vector.broadcast %cst : f32 to vector<1x4x128xf32>
    %c0 = arith.constant 0 : index
    %c0_0 = arith.constant 0 : index
    %c0_1 = arith.constant 0 : index
    %1 = vector.load %arg1[%c0, %c0_0, %c0_1] : memref<1x4x256xf32, #tpu.memory_space<vmem>>, vector<1x4x128xf32>
    %2 = arith.addf %0, %1 : vector<1x4x128xf32>
    %c0_2 = arith.constant 0 : index
    %c0_3 = arith.constant 0 : index
    %c128 = arith.constant 128 : index
    %3 = vector.load %arg1[%c0_2, %c0_3, %c128] : memref<1x4x256xf32, #tpu.memory_space<vmem>>, vector<1x4x128xf32>
    %4 = arith.addf %2, %3 : vector<1x4x128xf32>
    %cst_4 = arith.constant dense<0.000000e+00> : vector<1x4xf32>
    %5 = vector.multi_reduction <add>, %4, %cst_4 [2] : vector<1x4x128xf32> to vector<1x4xf32>
    %cst_5 = arith.constant 3.906250e-03 : f32
    %6 = vector.broadcast %cst_5 : f32 to vector<1x4xf32>
    %7 = arith.mulf %5, %6 : vector<1x4xf32>
    %c0_6 = arith.constant 0 : index
    %c0_7 = arith.constant 0 : index
    %8 = vector.load %arg2[%c0_6, %c0_7] : memref<4x4xf32, #tpu.memory_space<vmem>>, vector<4x4xf32>
    %c0_8 = arith.constant 0 : index
    %c0_9 = arith.constant 0 : index
    %9 = vector.load %arg3[%c0_8, %c0_9] : memref<4x4xf32, #tpu.memory_space<vmem>>, vector<4x4xf32>
    %cst_10 = arith.constant dense<0.000000e+00> : vector<1x4xf32>
    %10 = tpu.matmul %7, %8, %cst_10 {dimension_numbers = #tpu.dot_dimension_numbers<[1], [1], [0], [0], [0, 0, 1, 0], [], []>} : vector<1x4xf32>, vector<4x4xf32>, vector<1x4xf32> -> vector<1x4xf32>
    %cst_11 = arith.constant 0.000000e+00 : f32
    %11 = vector.broadcast %cst_11 : f32 to vector<1x4xf32>
    %12 = arith.maximumf %10, %11 : vector<1x4xf32>
    %cst_12 = arith.constant dense<0.000000e+00> : vector<1x4xf32>
    %13 = tpu.matmul %12, %9, %cst_12 {dimension_numbers = #tpu.dot_dimension_numbers<[1], [1], [0], [0], [0, 0, 1, 0], [], []>} : vector<1x4xf32>, vector<4x4xf32>, vector<1x4xf32> -> vector<1x4xf32>
    %14 = arith.negf %13 : vector<1x4xf32>
    %15 = math.exp %14 : vector<1x4xf32>
    %cst_13 = arith.constant 1.000000e+00 : f32
    %16 = vector.broadcast %cst_13 : f32 to vector<1x4xf32>
    %17 = arith.addf %16, %15 : vector<1x4xf32>
    %18 = arith.divf %16, %17 : vector<1x4xf32>
    %19 = vector.shape_cast %18 : vector<1x4xf32> to vector<1x4x1xf32>
    %c0_14 = arith.constant 0 : index
    %c0_15 = arith.constant 0 : index
    %c0_16 = arith.constant 0 : index
    %20 = vector.load %arg1[%c0_14, %c0_15, %c0_16] : memref<1x4x256xf32, #tpu.memory_space<vmem>>, vector<1x4x128xf32>
    %21 = vector.broadcast %19 : vector<1x4x1xf32> to vector<1x4x128xf32>
    %22 = arith.mulf %20, %21 : vector<1x4x128xf32>
    %c0_17 = arith.constant 0 : index
    %c0_18 = arith.constant 0 : index
    %c0_19 = arith.constant 0 : index
    %23 = vector.load %arg4[%c0_17, %c0_18, %c0_19] : memref<1x4x256xf32, #tpu.memory_space<vmem>>, vector<1x4x128xf32>
    tpu.vector_store %arg4[%c0_17, %c0_18, %c0_19], %22 {strides = array<i32>} : memref<1x4x256xf32, #tpu.memory_space<vmem>>, vector<1x4x128xf32>,
    %c0_20 = arith.constant 0 : index
    %c0_21 = arith.constant 0 : index
    %c128_22 = arith.constant 128 : index
    %24 = vector.load %arg1[%c0_20, %c0_21, %c128_22] : memref<1x4x256xf32, #tpu.memory_space<vmem>>, vector<1x4x128xf32>
    %25 = vector.broadcast %19 : vector<1x4x1xf32> to vector<1x4x128xf32>
    %26 = arith.mulf %24, %25 : vector<1x4x128xf32>
    %c0_23 = arith.constant 0 : index
    %c0_24 = arith.constant 0 : index
    %c128_25 = arith.constant 128 : index
    %27 = vector.load %arg4[%c0_23, %c0_24, %c128_25] : memref<1x4x256xf32, #tpu.memory_space<vmem>>, vector<1x4x128xf32>
    tpu.vector_store %arg4[%c0_23, %c0_24, %c128_25], %26 {strides = array<i32>} : memref<1x4x256xf32, #tpu.memory_space<vmem>>, vector<1x4x128xf32>,
    return
  }
  func.func @transform_0(%arg0: i32) -> (i32, i32, i32) {
    %c0_i32 = arith.constant 0 : i32
    %c0_i32_0 = arith.constant 0 : i32
    %c0_i32_1 = arith.constant 0 : i32
    return %arg0, %c0_i32, %c0_i32_0 : i32, i32, i32
  }
  func.func @transform_1(%arg0: i32) -> (i32, i32) {
    %c0_i32 = arith.constant 0 : i32
    %c0_i32_0 = arith.constant 0 : i32
    %c0_i32_1 = arith.constant 0 : i32
    return %c0_i32, %c0_i32_0 : i32, i32
  }
  func.func @transform_2(%arg0: i32) -> (i32, i32) {
    %c0_i32 = arith.constant 0 : i32
    %c0_i32_0 = arith.constant 0 : i32
    %c0_i32_1 = arith.constant 0 : i32
    return %c0_i32, %c0_i32_0 : i32, i32
  }
  func.func @transform_3(%arg0: i32) -> (i32, i32, i32) {
    %c0_i32 = arith.constant 0 : i32
    %c0_i32_0 = arith.constant 0 : i32
    %c0_i32_1 = arith.constant 0 : i32
    return %arg0, %c0_i32, %c0_i32_0 : i32, i32, i32
  }
}

</mosaic_0001>

<bundles_post_ra>
// kernel: tpu_custom_call.1
= control target key start
LH: loop header
LB: loop body
LE: loop exit
PB: predicated region body
PF: predicated region fallthrough
CT: control target
= control target key end

     0   :  { %8 = vsyncpa [#allocation3], 0  ;;  %s956_s0 = inlined_call_operand.hbm [shape: f32[2,4,256], index: 0, kind: input, shape index: {}]   ;;  %s957_s1 = inlined_call_operand.hbm [shape: f32[4,4], index: 1, kind: input, shape index: {}]   ;;  %s958_s2 = inlined_call_operand.vmem [shape: f32[4,4], index: 2, kind: input, shape index: {}]   ;;  %s959_s3 = inlined_call_operand.hbm [shape: f32[2,4,256], index: 3, kind: output, shape index: {}]  }
   0x1   :  { %10 = vsyncpa [#allocation3 + $0x1], 0 }
   0x2   :  { %11 = vsyncpa [#allocation6], 0 }
   0x3   :  { %12 = vsyncpa [#allocation4], 0 }
   0x4   :  { %14 = vsyncpa [#allocation4 + $0x1], 0  ;;  %s739_s12 = smov 0   ;;  %s741_s13 = smov 0  }
   0x5   :  { %s743_s14 = smov 0   ;;  %s745_s15 = smov 0  }
   0x6 LB: > { %s760_s16 = sadd.s32 4294967295, %s712_s15   ;;  %s484_s17 = sadd.s32 4294967294, %s712_s15   ;;  %s712_s15 = sphi %s745_s15, %s983_s15   ;;  %s708_s14 = sphi %s743_s14, %s982_s14   ;;  %s704_s13 = sphi %s741_s13, %s981_s13   ;;  %s700_s12 = sphi %s739_s12, %s980_s12  }
   0x7   : > { %p40_p0 = scmp.ne.s32.totalorder %s704_s13, %s700_s12  ;;  %p960_p1 = scmp.eq.s32.totalorder %s760_s16, 0 }
   0x8   : > { %p112_p3 = scmp.eq.s32.totalorder %s484_s17, 1  ;;  %p485_p5 = scmp.ge.s32.totalorder %s712_s15, 1 }
   0x9   : > { %p769_p4 = por %p960_p1, %p40_p0  ;;  %p119_p7 = scmp.lt.s32.totalorder %s712_s15, 3 }
   0xa   : > { %p774_p6 = por %p112_p3, %p40_p0  ;;  %s714_s21 = smov [#allocation5]  }
   0xb   : > { %s963_s18 = scalar_select %p769_p4, 1, 0 }
   0xc   : > { %s964_s19 = scalar_select %p774_p6, 1, 0 }
   0xd   : > { %p779_p8 = pnand %p485_p5, %p119_p7  ;;  %s132_s22 = sshll.u32 %s714_s21, 4  ;;  %s133_s22 = int_to_ptr.vmem [resolvable:$true] %s132_s22 }
   0xe   : > { %s787_s23 = sadd.s32 1, %s712_s15   ;;  %s27_s27 = sadd.s32 1, %s708_s14 }
   0xf   : > { %s965_s20 = scalar_select %p779_p8, 1, 0 }
  0x10   : > { %p529_p10 = pneg %p779_p8  ;;  %s24_s25 = ssub.s32 %s712_s15, %s787_s23 }
  0x11   : > { %p797_p12 = scmp.eq.s32.totalorder %s24_s25, 0  ;;  %s584_s30 = scalar_lea.hbm %s957_s1, 64 }
  0x12   : > { %p791_p11 = pnand %p529_p10, %p960_p1  ;;  %p585_p0 = scmp.ne.s32.totalorder %s957_s1, %s584_s30 }
  0x13   : > { %s967_s26 = scalar_select %p797_p12, 1, 0 }
  0x14   : > { %p586_p3 = pneg %p791_p11  ;;  %p591_p10 = scmp.lt.u32.totalorder %s584_s30, %s957_s1 }
  0x16   : > { %p587_p5 = pnand %p586_p3, %p585_p0 }
  0x18   : > { %p588_p7 = pneg %p587_p5 }
  0x1a   : > { %p593_p9 = pnand %p591_p10, %p588_p7 }
  0x1c   : > { %596 = shalt.err (!%p593_p9)
}
  0x1d   : > { %s597_s8 = scalar_lea.vmem %s133_s22, 64  ;;  %p605_p6 = scmp.lt.s32.totalorder %s133_s22, %s133_s22 }
  0x1e   : > { %p598_p1 = scmp.ne.s32.totalorder %s133_s22, %s597_s8  ;;  %p606_p4 = scmp.lt.s32.totalorder %s597_s8, %s597_s8 }
  0x20   : > { %p600_p2 = pnand %p598_p1, %p586_p3  ;;  %p607_p8 = por %p606_p4, %p605_p6 }
  0x22   : > { %p601_p13 = pneg %p600_p2 }
  0x24   : > { %p608_p12 = pnand %p607_p8, %p601_p13 }
  0x26   : > { %611 = shalt.err (!%p608_p12)
}
  0x27   : > { %532 = dma.hbm_to_vmem [thread:$0]  (!%p791_p11), %s957_s1, 64, %s133_s22, [#allocation6]  }
  0x28   : > { %p968_p1 = scmp.ne.s32.totalorder %s967_s26, 0  ;;  %p35_p2 = scmp.eq.s32.totalorder %s712_s15, 0 }
  0x29   : > { %p969_p4 = scmp.ne.s32.totalorder %s708_s14, %s704_s13  ;;  %p970_p6 = scmp.eq.s32.totalorder %s760_s16, 1 }
  0x2a   : > { %s823_s11 = scalar_select %p968_p1, %s708_s14, %s27_s27  }
  0x2b   : > { %p831_p8 = por %p970_p6, %p969_p4  ;;  %p542_p9 = scmp.lt.s32.totalorder %s712_s15, 2 }
  0x2c   : > { %s146_s21 = sand.u32 1, %s708_s14   ;;  %p972_p12 = pmov %p969_p4 }
  0x2d   : > { %s488_s24 = sshll.u32 %s146_s21, 3  ;;  %s505_s25 = sshll.u32 %s712_s15, 7 }
  0x2e   : > { %p36_p13 = por %p35_p2, %p972_p12  ;;  %s844_s22 = scalar_lea.hbm %s956_s0, %s505_s25 }
  0x2f   : > { %s150_s26 = scalar_lea.vmem [#allocation2], %s488_s24  ;;  %s147_s4 = scalar_lea.sflag [#allocation3], %s146_s21 }
  0x30   : > { %s158_s27 = sshll.u32 %s150_s26, 4  ;;  %p846_p11 = pnand %p542_p9, %p36_p13  ;;  %s850_s27 = int_to_ptr.vmem [resolvable:$true] %s158_s27 }
  0x31   : > { %s612_s5 = scalar_lea.hbm %s844_s22, 128  ;;  %s617_s8 = scalar_lea.hbm %s956_s0, 256 }
  0x32   : > { %p613_p0 = scmp.ne.s32.totalorder %s844_s22, %s612_s5  ;;  %p614_p3 = pneg %p846_p11 }
  0x33   : > { %p618_p10 = scmp.lt.u32.totalorder %s844_s22, %s956_s0  ;;  %p619_p1 = scmp.lt.u32.totalorder %s617_s8, %s612_s5 }
  0x34   : > { %p615_p5 = pnand %p614_p3, %p613_p0  ;;  %p621_p4 = scmp.lt.u32.totalorder %s612_s5, %s844_s22 }
  0x35   : > { %p620_p2 = por %p619_p1, %p618_p10 }
  0x36   : > { %p616_p7 = pneg %p615_p5 }
  0x37   : > { %p622_p6 = por %p621_p4, %p620_p2 }
  0x39   : > { %p623_p9 = pnand %p622_p6, %p616_p7 }
  0x3b   : > { %626 = shalt.err (!%p623_p9)
}
  0x3c   : > { %s627_s21 = scalar_lea.vmem %s850_s27, 128  ;;  %s715_s24 = smov [#allocation2]  }
  0x3d   : > { %p628_p12 = scmp.ne.s32.totalorder %s850_s27, %s627_s21  ;;  %s632_s25 = sshll.u32 %s715_s24, 4  ;;  %s633_s25 = int_to_ptr.vmem [resolvable:$false] %s632_s25 }
  0x3e   : > { %s634_s28 = scalar_lea.vmem %s633_s25, 256  ;;  %p635_p5 = scmp.lt.s32.totalorder %s850_s27, %s633_s25 }
  0x3f   : > { %p630_p13 = pnand %p628_p12, %p614_p3  ;;  %p636_p10 = scmp.lt.s32.totalorder %s634_s28, %s627_s21 }
  0x41   : > { %p631_p0 = pneg %p630_p13  ;;  %p637_p1 = por %p636_p10, %p635_p5 }
  0x43   : > { %p638_p2 = pnand %p637_p1, %p631_p0 }
  0x45   : > { %641 = shalt.err (!%p638_p2)
}
  0x46   : > { %536 = dma.hbm_to_vmem [thread:$0]  (!%p846_p11), %s844_s22, 128, %s850_s27, %s147_s4  }
  0x47   : > { %p974_p7 = scmp.ne.s32.totalorder %s965_s20, 0 }
  0x48   : > { %s880_s29 = sand.u32 (!%p974_p7), 1, %s704_s13   ;;  %p975_p3 = scmp.ne.s32.totalorder (!%p974_p7), %s963_s18, 0 }
  0x49   : > { %167 = sbr.rel (%p974_p7) target bundleno = 819 (0x333), region = 32  ;;  %s492_s26 = sshll.u32 (!%p974_p7), %s880_s29, 3 }
  0x4a   : > { %s170_s5 = scalar_lea.sflag (!%p974_p7), [#allocation3], %s880_s29  ;;  %s886_s6 = scalar_lea.vmem (!%p974_p7), [#allocation2], %s492_s26 }
  0x50   : > { %687 = dma.done.wait (%p975_p3), %s170_s5, 128  }
  0x51   : > { %689 = vsyncadd (%p975_p3), %s170_s5, 4294967168  ;;  %p976_p11 = scmp.eq.s32.totalorder %s760_s16, 0 }
  0x53   : > { %691 = dma.done.wait (%p976_p11), [#allocation6], 64   ;;  %p977_p4 = pmov %p976_p11 }
  0x54   : > { %v200_v0 = vld [vmem:[%s886_s6] sm:$0xf]  ;;  %v202_v1 = vld [vmem:[%s886_s6 + $0x4] sm:$0xf]  ;;  %vm204_vm0 = vcmask 1043456   ;;  %v716_v4 = vmov 0.0   ;;  %v212_v6 = vlaneseq }
  0x55   : > { %693 = vsyncadd (%p977_p4), [#allocation6], 4294967232  ;;  %v203_v2 = vadd.f32 %v202_v1, %v200_v0  ;;  %511 = vmatprep.subr.mxu0 %v716_v4  ;;  %v209_v5 = vld [vmem:[#allocation5] sm:$0xf]  ;;  %vm218_vm1 = vcmask 31744   ;;  %516 = vmatprep.subr.mxu1 %v716_v4  ;;  %vm717_vm2 = vmmov 0  }
  0x56   : > { %512 = vmatpush3.xpose.msk.msra.mxu0 %vm218_vm1, %v209_v5  ;;  %513 = vmatprep.mubr.msk.f32.mxu0 %vm717_vm2, %v716_v4  ;;  %v213_v7 = vand.u32 127, %v212_v6  ;;  %v215_v8 = vshrl.u32 %v212_v6, 7  ;;  %v210_v13 = vld [vmem:[%s958_s2] sm:$0xf]  ;;  %v386_v25 = vld [vmem:[%s886_s6 + $0x4] sm:$0xf] }
  0x57   : > { %v205_v3 = vsel %vm204_vm0, %v203_v2, 0.0  ;;  %518 = vmatprep.mubr.msk.f32.mxu1 %vm717_vm2, %v716_v4  ;;  %517 = vmatpush3.xpose.msk.msra.mxu1 %vm218_vm1, %v210_v13  ;;  %s506_s22 = sshll.u32 %s760_s16, 7  ;;  %s199_s27 = scalar_lea.vmem [#allocation7], %s492_s26 }
  0x58   : > { %206 = vadd.xlane.f32.xlu0 %v205_v3  ;;  %v216_v9 = vsub.s32 %v213_v7, %v215_v8  ;;  %v379_v22 = vsub.s32 0, %v215_v8  ;;  %s404_s30 = sshll.u32 %s199_s27, 4  ;;  %s912_s8 = scalar_lea.hbm %s959_s3, %s506_s22  ;;  %s914_s30 = int_to_ptr.vmem [resolvable:$true] %s404_s30 }
  0x59   : > { %s390_s9 = scalar_lea.sflag [#allocation4], %s880_s29  ;;  %s642_s16 = scalar_lea.vmem %s914_s30, 128 }
  0x5a   : > { %p643_p6 = scmp.ne.s32.totalorder %s914_s30, %s642_s16  ;;  %s718_s10 = smov [#allocation7]  }
  0x5b   : > { %s646_s21 = sshll.u32 %s718_s10, 4  ;;  %s647_s21 = int_to_ptr.vmem [resolvable:$false] %s646_s21 }
  0x5c   : > { %p644_p9 = pnand %p643_p6, %p831_p8  ;;  %s648_s24 = scalar_lea.vmem %s647_s21, 256 }
  0x5d   : > { %p649_p13 = scmp.lt.s32.totalorder %s914_s30, %s647_s21  ;;  %p650_p0 = scmp.lt.s32.totalorder %s648_s24, %s642_s16 }
  0x5e   : > { %p645_p12 = pneg %p644_p9 }
  0x5f   : > { %p651_p5 = por %p650_p0, %p649_p13 }
  0x61   : > { %p652_p10 = pnand %p651_p5, %p645_p12 }
  0xe5   : > { %v207_v10 = vpop.xlane.xlu0 %206 }
  0xe6   : > { %v208_v11 = vmul.f32 0.00390625, %v207_v10 }
  0xe8   : > { %v217_v12 = vrot.slane %v208_v11, %v216_v9 }
  0xea   : > { %514 = vmatmul.mubr.msk.f32.vlgmr.msra.gmra.mrb[0].mxu0 %vm218_vm1, %v217_v12 }
 0x1bd   : > { %v290_v14 = vpop.f32.mrb[0].mxu0 }
 0x1be   : > { %v294_v15 = vmax.f32 %v290_v14, 0.0  ;;  %v515_v16 = vpop.f32.mrb[1].mxu0 }
 0x1c0   : > { %519 = vmatmul.mubr.msk.f32.vlgmr.msra.gmra.mrb[0].mxu1 %vm218_vm1, %v294_v15 }
 0x293   : > { %v367_v17 = vpop.f32.mrb[0].mxu1 }
 0x294   : > { %v499_v18 = vmul.f32 -1.442695, %v367_v17  ;;  %v520_v19 = vpop.f32.mrb[1].mxu1 }
 0x296   : > { %580 = vpow2.f32 %v499_v18 }
 0x2a0   : > { %v581_v20 = vpop.eup %580 }
 0x2a1   : > { %v374_v21 = vadd.f32 1.0, %v581_v20 }
 0x2a3   : > { %582 = vrcp.f32 %v374_v21 }
 0x2ad   : > { %v583_v23 = vpop.eup %582 }
 0x2ae   : > { %v380_v24 = vrot.slane %v583_v23, %v379_v22 }
 0x2b0   : > { %382 = vbcast.lane.b32.xlu0 %v380_v24, 256 }
 0x322   : > { %v383_v26 = vpop.permute.xlu0 %382 }
 0x323   : > { %v384_v27 = vmul.f32 %v383_v26, %v200_v0  ;;  %v387_v28 = vmul.f32 %v386_v25, %v383_v26 }
 0x325   : > { %385 = vst [vmem:[%s199_s27] sm:$0xf] %v384_v27  ;;  %388 = vst [vmem:[%s199_s27 + $0x4] sm:$0xf] %v387_v28 }
 0x326   : > { %655 = shalt.err (!%p652_p10)
}
 0x327   : > { %s656_s25 = scalar_lea.hbm %s912_s8, 128  ;;  %s660_s26 = scalar_lea.hbm %s959_s3, 256 }
 0x328   : > { %p657_p1 = scmp.ne.s32.totalorder %s912_s8, %s656_s25  ;;  %p661_p3 = scmp.lt.u32.totalorder %s912_s8, %s959_s3 }
 0x329   : > { %p662_p11 = scmp.lt.u32.totalorder %s660_s26, %s656_s25  ;;  %p664_p6 = scmp.lt.u32.totalorder %s656_s25, %s912_s8 }
 0x32a   : > { %p658_p2 = pnand %p657_p1, %p831_p8 }
 0x32b   : > { %p663_p4 = por %p662_p11, %p661_p3 }
 0x32c   : > { %p659_p7 = pneg %p658_p2 }
 0x32d   : > { %p665_p9 = por %p664_p6, %p663_p4 }
 0x32f   : > { %p666_p12 = pnand %p665_p9, %p659_p7 }
 0x331   : > { %669 = shalt.err (!%p666_p12)
}
 0x332   : > { %527 = dma.vmem_to_hbm [thread:$0]  (%p831_p8), %s914_s30, 128, %s912_s8, %s390_s9  }
 0x333 PF: > { %s416_s18 = sand.u32 1, %s700_s12   ;;  %p978_p13 = scmp.ne.s32.totalorder %s964_s19, 0 }
 0x334   : > { %p979_p0 = scmp.ge.s32.totalorder %s712_s15, 2  ;;  %s417_s20 = scalar_lea.sflag [#allocation4], %s416_s18 }
 0x336   : > { %p538_p5 = pnand %p979_p0, %p978_p13 }
 0x338   : > { %695 = dma.done.wait (!%p538_p5), %s417_s20, 128  }
 0x339   : > { %697 = vsyncadd (!%p538_p5), %s417_s20, 4294967168  ;;  %p17_p10 = scmp.ge.s32.totalorder %s787_s23, 4   ;;  %s980_s12 = smov %s704_s13 }
 0x33a   : > { %s981_s13 = smov %s708_s14  ;;  %s982_s14 = smov %s823_s11 }
 0x33b   : > { %s983_s15 = smov %s787_s23  ;;  %19 = sbr.rel (!%p17_p10) target bundleno = 6 (0x6), region = 81 }
 0x342   :  { %422 = vsyncpa [#allocation3], 1 }
 0x343   :  { %424 = vsyncpa [#allocation3 + $0x1], 1 }
 0x344   :  { %425 = vsyncpa [#allocation6], 1 }
 0x345   :  { %426 = vsyncpa [#allocation4], 1 }
 0x346   :  { %428 = vsyncpa [#allocation4 + $0x1], 1 }

</bundles_post_ra>
